<compile_context>
chip_gen: v7x
topology: tpu7x:2x2x1
jax: 0.10.0
libtpu: 0.0.40
codegen_flags: <defaults>
</compile_context>

<pallas_src>
import functools

import jax
import jax.numpy as jnp
from jax.experimental import pallas as pl
from jax.experimental.pallas import tpu as pltpu

_LANE = 128
_IN_FEATURES = 784
_LAYER_DIMS = [(784, 56), (56, 26), (26, 15), (15, 10)]
_NUM_CLASSES = 10
_NEG_BIG = -1e30  # padded-logit bias so padded lanes drop out of the softmax


def _mlp_logsoftmax_kernel(x_ref, w0_ref, b0_ref, w1_ref, b1_ref,
                           w2_ref, b2_ref, w3_ref, b3_ref, o_ref):
    # f0: Linear(784 -> 56)  (padded to 128 output lanes, padding is zero)
    h = jnp.dot(x_ref[...], w0_ref[...],
                preferred_element_type=jnp.float32) + b0_ref[...]
    # f1: Linear(56 -> 26)
    h = jnp.dot(h, w1_ref[...],
                preferred_element_type=jnp.float32) + b1_ref[...]
    # f2: Tanh  (tanh(0) = 0, so zero-padded lanes stay zero)
    h = jnp.tanh(h)
    # f3: Linear(26 -> 15)
    h = jnp.dot(h, w2_ref[...],
                preferred_element_type=jnp.float32) + b2_ref[...]
    # f4: Tanh
    h = jnp.tanh(h)
    # f5: Linear(15 -> 10); padded logit lanes carry a -1e30 bias
    h = jnp.dot(h, w3_ref[...],
                preferred_element_type=jnp.float32) + b3_ref[...]
    # f6: LogSoftmax(dim=1), max-shifted; exp(-1e30 - m) == 0 so padded lanes
    # contribute nothing to the reduction.
    m = jnp.max(h, axis=-1, keepdims=True)
    s = h - m
    lse = jnp.log(jnp.sum(jnp.exp(s), axis=-1, keepdims=True))
    o_ref[...] = (s - lse).astype(o_ref.dtype)


def pad_params(params):
    """One-time lane padding: weights -> (in_pad, 128) with zeros, biases ->
    (1, 128) with zeros, except the final bias whose padded lanes get -1e30."""
    padded = []
    n_layers = len(params)
    for idx, (w, b) in enumerate(params):
        fan_in, fan_out = w.shape
        in_pad = _IN_FEATURES if idx == 0 else _LANE
        wp = jnp.zeros((in_pad, _LANE), jnp.float32).at[:fan_in, :fan_out].set(
            w.astype(jnp.float32))
        fill = 0.0 if idx + 1 < n_layers else _NEG_BIG
        bp = jnp.full((1, _LANE), fill, jnp.float32).at[:, :fan_out].set(
            jnp.reshape(b, (1, fan_out)).astype(jnp.float32))
        padded.append((wp, bp))
    return tuple(padded)


def _tile_rows(b):
    # TB=1024 (~3.2 MiB x-tile, ~8.7 MiB total double-buffered) is near the
    # measured HBM-roofline knee; small batches round up to the 8-row sublane.
    if b >= 1024:
        return 1024
    return max(8, ((b + 7) // 8) * 8)


@functools.partial(jax.jit, static_argnames=())
def lineartanh_14_forward(x, padded_params):
    """x: (B, 1, 28, 28) float32 NCHW. Returns (B, 10) log-probabilities."""
    b = x.shape[0]
    x2d = x.reshape(b, _IN_FEATURES)  # same as torch x.view(B, 784)

    tb = _tile_rows(b)
    bp = pl.cdiv(b, tb) * tb
    if bp != b:
        # zero-padded tail rows flow through harmlessly and are sliced off
        x2d = jnp.pad(x2d, ((0, bp - b), (0, 0)))

    (w0, b0), (w1, b1), (w2, b2), (w3, b3) = padded_params

    def row_map(i):
        return (i, 0)

    def const_map(i):
        return (0, 0)

    in_specs = [
        pl.BlockSpec((tb, _IN_FEATURES), row_map),       # x tile (streamed)
        pl.BlockSpec((_IN_FEATURES, _LANE), const_map),  # W0 (resident)
        pl.BlockSpec((1, _LANE), const_map),             # b0
        pl.BlockSpec((_LANE, _LANE), const_map),         # W1
        pl.BlockSpec((1, _LANE), const_map),             # b1
        pl.BlockSpec((_LANE, _LANE), const_map),         # W2
        pl.BlockSpec((1, _LANE), const_map),             # b2
        pl.BlockSpec((_LANE, _LANE), const_map),         # W3
        pl.BlockSpec((1, _LANE), const_map),             # b3
    ]
    out_specs = pl.BlockSpec((tb, _LANE), row_map)       # lane-dense store

    flops = 2 * b * sum(fi * fo for fi, fo in _LAYER_DIMS)
    transcendentals = b * (26 + 15 + 10)                 # tanh x2 + exp
    weight_bytes = 4 * sum(fi * fo + fo for fi, fo in _LAYER_DIMS)
    bytes_accessed = 4 * b * _IN_FEATURES + 4 * b * _NUM_CLASSES + weight_bytes

    out_padded = pl.pallas_call(
        _mlp_logsoftmax_kernel,
        out_shape=jax.ShapeDtypeStruct((bp, _LANE), jnp.float32),
        grid=(bp // tb,),
        in_specs=in_specs,
        out_specs=out_specs,
        compiler_params=pltpu.CompilerParams(
            dimension_semantics=("parallel",),
            vmem_limit_bytes=32 * 1024 * 1024,
        ),
        cost_estimate=pl.CostEstimate(
            flops=flops,
            transcendentals=transcendentals,
            bytes_accessed=bytes_accessed,
        ),
    )(x2d, w0, b0, w1, b1, w2, b2, w3, b3)

    return out_padded[:b, :_NUM_CLASSES]


def init_params(key):
    """Deterministic init mimicking nn.Linear's U(-1/sqrt(fan_in), 1/sqrt(fan_in)).

    Weights stored as (in_features, out_features); biases as (out,)."""
    params = []
    for (fan_in, fan_out) in _LAYER_DIMS:
        key, kw, kb = jax.random.split(key, 3)
        bound = 1.0 / jnp.sqrt(jnp.float32(fan_in))
        w = jax.random.uniform(kw, (fan_in, fan_out), jnp.float32,
                               minval=-bound, maxval=bound)
        bias = jax.random.uniform(kb, (fan_out,), jnp.float32,
                                  minval=-bound, maxval=bound)
        params.append((w, bias))
    return tuple(params)


def reference_forward(x, params):
    """Pure-JAX reference matching the PyTorch module."""
    b = x.shape[0]
    h = x.reshape(b, _IN_FEATURES)
    (w0, b0), (w1, b1), (w2, b2), (w3, b3) = params
    h = h @ w0 + b0
    h = h @ w1 + b1
    h = jnp.tanh(h)
    h = h @ w2 + b2
    h = jnp.tanh(h)
    h = h @ w3 + b3
    return jax.nn.log_softmax(h, axis=-1)


if __name__ == "__main__":
    key = jax.random.PRNGKey(0)
    key_x, key_p = jax.random.split(key)

    batch = 2
    x = jax.random.normal(key_x, (batch, 1, 28, 28), jnp.float32)
    params = init_params(key_p)
    padded_params = pad_params(params)

    out = lineartanh_14_forward(x, padded_params)
    out = jax.block_until_ready(out)

    assert out.shape == (batch, _NUM_CLASSES)
    # log-softmax rows must sum (in prob space) to ~1
    row_sums = jnp.exp(out).sum(axis=1)
    assert jnp.allclose(row_sums, jnp.ones_like(row_sums), atol=1e-5)
    # match pure-JAX reference of the PyTorch module
    ref = reference_forward(x, params)
    assert jnp.allclose(out, ref, atol=1e-5, rtol=1e-5)

    print("KERNEL_OK")
</pallas_src>

<mosaic_0001>
module attributes {stable_mosaic.version = 11 : i64} {
  func.func @_mlp_logsoftmax_kernel(%arg0: i32, %arg1: memref<8x784xf32, #tpu.memory_space<vmem>>, %arg2: memref<784x128xf32, #tpu.memory_space<vmem>>, %arg3: memref<1x128xf32, #tpu.memory_space<vmem>>, %arg4: memref<128x128xf32, #tpu.memory_space<vmem>>, %arg5: memref<1x128xf32, #tpu.memory_space<vmem>>, %arg6: memref<128x128xf32, #tpu.memory_space<vmem>>, %arg7: memref<1x128xf32, #tpu.memory_space<vmem>>, %arg8: memref<128x128xf32, #tpu.memory_space<vmem>>, %arg9: memref<1x128xf32, #tpu.memory_space<vmem>>, %arg10: memref<8x128xf32, #tpu.memory_space<vmem>>) attributes {dimension_semantics = [#tpu.dimension_semantics<parallel>], iteration_bounds = array<i64: 1>, scalar_prefetch = 0 : i64, scratch_operands = 0 : i64, tpu.core_type = #tpu.core_type<tc>, window_params = [{transform_indices = @transform_0, window_bounds = array<i64: 8, 784>}, {pipeline_mode = #tpu.pipeline_mode<synchronous>, transform_indices = @transform_1, window_bounds = array<i64: 784, 128>}, {pipeline_mode = #tpu.pipeline_mode<synchronous>, transform_indices = @transform_2, window_bounds = array<i64: 1, 128>}, {pipeline_mode = #tpu.pipeline_mode<synchronous>, transform_indices = @transform_3, window_bounds = array<i64: 128, 128>}, {pipeline_mode = #tpu.pipeline_mode<synchronous>, transform_indices = @transform_4, window_bounds = array<i64: 1, 128>}, {pipeline_mode = #tpu.pipeline_mode<synchronous>, transform_indices = @transform_5, window_bounds = array<i64: 128, 128>}, {pipeline_mode = #tpu.pipeline_mode<synchronous>, transform_indices = @transform_6, window_bounds = array<i64: 1, 128>}, {pipeline_mode = #tpu.pipeline_mode<synchronous>, transform_indices = @transform_7, window_bounds = array<i64: 128, 128>}, {pipeline_mode = #tpu.pipeline_mode<synchronous>, transform_indices = @transform_8, window_bounds = array<i64: 1, 128>}, {transform_indices = @transform_9, window_bounds = array<i64: 8, 128>}]} {
    %c0 = arith.constant 0 : index
    %c0_0 = arith.constant 0 : index
    %0 = vector.load %arg1[%c0, %c0_0] : memref<8x784xf32, #tpu.memory_space<vmem>>, vector<8x784xf32>
    %c0_1 = arith.constant 0 : index
    %c0_2 = arith.constant 0 : index
    %1 = vector.load %arg2[%c0_1, %c0_2] : memref<784x128xf32, #tpu.memory_space<vmem>>, vector<784x128xf32>
    %cst = arith.constant dense<0.000000e+00> : vector<8x128xf32>
    %2 = tpu.matmul %0, %1, %cst {dimension_numbers = #tpu.dot_dimension_numbers<[1], [0], [0], [1], [0, 0, 1, 1], [], []>} : vector<8x784xf32>, vector<784x128xf32>, vector<8x128xf32> -> vector<8x128xf32>
    %c0_3 = arith.constant 0 : index
    %c0_4 = arith.constant 0 : index
    %3 = vector.load %arg3[%c0_3, %c0_4] : memref<1x128xf32, #tpu.memory_space<vmem>>, vector<1x128xf32>
    %4 = vector.broadcast %3 : vector<1x128xf32> to vector<8x128xf32>
    %5 = arith.addf %2, %4 : vector<8x128xf32>
    %c0_5 = arith.constant 0 : index
    %c0_6 = arith.constant 0 : index
    %6 = vector.load %arg4[%c0_5, %c0_6] : memref<128x128xf32, #tpu.memory_space<vmem>>, vector<128x128xf32>
    %cst_7 = arith.constant dense<0.000000e+00> : vector<8x128xf32>
    %7 = tpu.matmul %5, %6, %cst_7 {dimension_numbers = #tpu.dot_dimension_numbers<[1], [0], [0], [1], [0, 0, 1, 1], [], []>} : vector<8x128xf32>, vector<128x128xf32>, vector<8x128xf32> -> vector<8x128xf32>
    %c0_8 = arith.constant 0 : index
    %c0_9 = arith.constant 0 : index
    %8 = vector.load %arg5[%c0_8, %c0_9] : memref<1x128xf32, #tpu.memory_space<vmem>>, vector<1x128xf32>
    %9 = vector.broadcast %8 : vector<1x128xf32> to vector<8x128xf32>
    %10 = arith.addf %7, %9 : vector<8x128xf32>
    %11 = math.tanh %10 : vector<8x128xf32>
    %c0_10 = arith.constant 0 : index
    %c0_11 = arith.constant 0 : index
    %12 = vector.load %arg6[%c0_10, %c0_11] : memref<128x128xf32, #tpu.memory_space<vmem>>, vector<128x128xf32>
    %cst_12 = arith.constant dense<0.000000e+00> : vector<8x128xf32>
    %13 = tpu.matmul %11, %12, %cst_12 {dimension_numbers = #tpu.dot_dimension_numbers<[1], [0], [0], [1], [0, 0, 1, 1], [], []>} : vector<8x128xf32>, vector<128x128xf32>, vector<8x128xf32> -> vector<8x128xf32>
    %c0_13 = arith.constant 0 : index
    %c0_14 = arith.constant 0 : index
    %14 = vector.load %arg7[%c0_13, %c0_14] : memref<1x128xf32, #tpu.memory_space<vmem>>, vector<1x128xf32>
    %15 = vector.broadcast %14 : vector<1x128xf32> to vector<8x128xf32>
    %16 = arith.addf %13, %15 : vector<8x128xf32>
    %17 = math.tanh %16 : vector<8x128xf32>
    %c0_15 = arith.constant 0 : index
    %c0_16 = arith.constant 0 : index
    %18 = vector.load %arg8[%c0_15, %c0_16] : memref<128x128xf32, #tpu.memory_space<vmem>>, vector<128x128xf32>
    %cst_17 = arith.constant dense<0.000000e+00> : vector<8x128xf32>
    %19 = tpu.matmul %17, %18, %cst_17 {dimension_numbers = #tpu.dot_dimension_numbers<[1], [0], [0], [1], [0, 0, 1, 1], [], []>} : vector<8x128xf32>, vector<128x128xf32>, vector<8x128xf32> -> vector<8x128xf32>
    %c0_18 = arith.constant 0 : index
    %c0_19 = arith.constant 0 : index
    %20 = vector.load %arg9[%c0_18, %c0_19] : memref<1x128xf32, #tpu.memory_space<vmem>>, vector<1x128xf32>
    %21 = vector.broadcast %20 : vector<1x128xf32> to vector<8x128xf32>
    %22 = arith.addf %19, %21 : vector<8x128xf32>
    %cst_20 = arith.constant dense<0xFF800000> : vector<8xf32>
    %23 = vector.multi_reduction <maximumf>, %22, %cst_20 [1] : vector<8x128xf32> to vector<8xf32>
    %24 = vector.shape_cast %23 : vector<8xf32> to vector<8x1xf32>
    %25 = vector.broadcast %24 : vector<8x1xf32> to vector<8x128xf32>
    %26 = arith.subf %22, %25 : vector<8x128xf32>
    %27 = math.exp %26 : vector<8x128xf32>
    %cst_21 = arith.constant dense<0.000000e+00> : vector<8xf32>
    %28 = vector.multi_reduction <add>, %27, %cst_21 [1] : vector<8x128xf32> to vector<8xf32>
    %29 = vector.shape_cast %28 : vector<8xf32> to vector<8x1xf32>
    %30 = math.log %29 : vector<8x1xf32>
    %31 = vector.broadcast %30 : vector<8x1xf32> to vector<8x128xf32>
    %32 = arith.subf %26, %31 : vector<8x128xf32>
    %c0_22 = arith.constant 0 : index
    %c0_23 = arith.constant 0 : index
    %33 = vector.load %arg10[%c0_22, %c0_23] : memref<8x128xf32, #tpu.memory_space<vmem>>, vector<8x128xf32>
    tpu.vector_store %arg10[%c0_22, %c0_23], %32 {strides = array<i32>} : memref<8x128xf32, #tpu.memory_space<vmem>>, vector<8x128xf32>,
    return
  }
  func.func @transform_0(%arg0: i32) -> (i32, i32) {
    %c0_i32 = arith.constant 0 : i32
    %c0_i32_0 = arith.constant 0 : i32
    return %arg0, %c0_i32 : i32, i32
  }
  func.func @transform_1(%arg0: i32) -> (i32, i32) {
    %c0_i32 = arith.constant 0 : i32
    %c0_i32_0 = arith.constant 0 : i32
    %c0_i32_1 = arith.constant 0 : i32
    return %c0_i32, %c0_i32_0 : i32, i32
  }
  func.func @transform_2(%arg0: i32) -> (i32, i32) {
    %c0_i32 = arith.constant 0 : i32
    %c0_i32_0 = arith.constant 0 : i32
    %c0_i32_1 = arith.constant 0 : i32
    return %c0_i32, %c0_i32_0 : i32, i32
  }
  func.func @transform_3(%arg0: i32) -> (i32, i32) {
    %c0_i32 = arith.constant 0 : i32
    %c0_i32_0 = arith.constant 0 : i32
    %c0_i32_1 = arith.constant 0 : i32
    return %c0_i32, %c0_i32_0 : i32, i32
  }
  func.func @transform_4(%arg0: i32) -> (i32, i32) {
    %c0_i32 = arith.constant 0 : i32
    %c0_i32_0 = arith.constant 0 : i32
    %c0_i32_1 = arith.constant 0 : i32
    return %c0_i32, %c0_i32_0 : i32, i32
  }
  func.func @transform_5(%arg0: i32) -> (i32, i32) {
    %c0_i32 = arith.constant 0 : i32
    %c0_i32_0 = arith.constant 0 : i32
    %c0_i32_1 = arith.constant 0 : i32
    return %c0_i32, %c0_i32_0 : i32, i32
  }
  func.func @transform_6(%arg0: i32) -> (i32, i32) {
    %c0_i32 = arith.constant 0 : i32
    %c0_i32_0 = arith.constant 0 : i32
    %c0_i32_1 = arith.constant 0 : i32
    return %c0_i32, %c0_i32_0 : i32, i32
  }
  func.func @transform_7(%arg0: i32) -> (i32, i32) {
    %c0_i32 = arith.constant 0 : i32
    %c0_i32_0 = arith.constant 0 : i32
    %c0_i32_1 = arith.constant 0 : i32
    return %c0_i32, %c0_i32_0 : i32, i32
  }
  func.func @transform_8(%arg0: i32) -> (i32, i32) {
    %c0_i32 = arith.constant 0 : i32
    %c0_i32_0 = arith.constant 0 : i32
    %c0_i32_1 = arith.constant 0 : i32
    return %c0_i32, %c0_i32_0 : i32, i32
  }
  func.func @transform_9(%arg0: i32) -> (i32, i32) {
    %c0_i32 = arith.constant 0 : i32
    %c0_i32_0 = arith.constant 0 : i32
    return %arg0, %c0_i32 : i32, i32
  }
}

</mosaic_0001>

<bundles_post_ra>
// kernel: lineartanh_14_forward.1
= control target key start
LH: loop header
LB: loop body
LE: loop exit
PB: predicated region body
PF: predicated region fallthrough
CT: control target
= control target key end

     0   :  { %14 = vsyncpa [#allocation3], 0  ;;  %s1510_s0 = inlined_call_operand.vmem [shape: f32[8,784], index: 0, kind: input, shape index: {}]   ;;  %s1511_s1 = inlined_call_operand.hbm [shape: f32[784,128], index: 1, kind: input, shape index: {}]   ;;  %s1512_s2 = inlined_call_operand.vmem [shape: f32[1,128], index: 2, kind: input, shape index: {}]   ;;  %s1513_s3 = inlined_call_operand.vmem [shape: f32[128,128], index: 3, kind: input, shape index: {}]   ;;  %s1514_s4 = inlined_call_operand.vmem [shape: f32[1,128], index: 4, kind: input, shape index: {}]   ;;  %s1515_s5 = inlined_call_operand.vmem [shape: f32[128,128], index: 5, kind: input, shape index: {}]   ;;  %s1516_s6 = inlined_call_operand.vmem [shape: f32[1,128], index: 6, kind: input, shape index: {}]   ;;  %s1517_s7 = inlined_call_operand.hbm [shape: f32[128,128], index: 7, kind: input, shape index: {}]   ;;  %s1518_s8 = inlined_call_operand.vmem [shape: f32[1,128], index: 8, kind: input, shape index: {}]   ;;  %s1519_s9 = inlined_call_operand.vmem [shape: f32[8,128], index: 9, kind: output, shape index: {}]  }
   0x1   :  { %15 = vsyncpa [#allocation5], 0  ;;  %s1264_s30 = smov [#allocation2]   ;;  %s1216_s13 = scalar_lea.hbm %s1511_s1, 12544 }
   0x2   :  { %s23_s10 = sshll.u32 %s1264_s30, 4  ;;  %p1217_p0 = scmp.ne.s32.totalorder %s1511_s1, %s1216_s13  ;;  %s24_s10 = int_to_ptr.vmem [resolvable:$true] %s23_s10 }
   0x3   :  { %p1220_p1 = scmp.lt.u32.totalorder %s1216_s13, %s1511_s1 }
   0x5   :  { %p1222_p2 = pnand %p1220_p1, %p1217_p0 }
   0x7   :  { %1225 = shalt.err (!%p1222_p2)
}
   0x8   :  { %s1226_s18 = scalar_lea.vmem %s24_s10, 12544  ;;  %p1231_p4 = scmp.lt.s32.totalorder %s24_s10, %s24_s10 }
   0x9   :  { %p1227_p3 = scmp.ne.s32.totalorder %s24_s10, %s1226_s18  ;;  %p1232_p5 = scmp.lt.s32.totalorder %s1226_s18, %s1226_s18 }
   0xb   :  { %p1233_p6 = por %p1232_p5, %p1231_p4 }
   0xd   :  { %p1234_p7 = pnand %p1233_p6, %p1227_p3 }
   0xf   :  { %1237 = shalt.err (!%p1234_p7)
}
  0x10   :  { %s1265_s19 = smov 128   ;;  %s1266_s20 = smov 8  }
  0x11   :  { %29 = dma.hbm_to_vmem [thread:$0]  %s1511_s1, 12544, %s24_s10, [#allocation3], %s1265_s19, %s1265_s19, %s1266_s20  }
  0x12   :  { %s1267_s23 = smov [#allocation4]   ;;  %s1238_s27 = scalar_lea.hbm %s1517_s7, 2048 }
  0x13   :  { %s45_s24 = sshll.u32 %s1267_s23, 4  ;;  %p1239_p8 = scmp.ne.s32.totalorder %s1517_s7, %s1238_s27  ;;  %s46_s24 = int_to_ptr.vmem [resolvable:$true] %s45_s24 }
  0x14   :  { %p1242_p9 = scmp.lt.u32.totalorder %s1238_s27, %s1517_s7 }
  0x16   :  { %p1244_p10 = pnand %p1242_p9, %p1239_p8 }
  0x18   :  { %1247 = shalt.err (!%p1244_p10)
}
  0x19   :  { %s1248_s12 = scalar_lea.vmem %s46_s24, 2048  ;;  %p1253_p12 = scmp.lt.s32.totalorder %s46_s24, %s46_s24 }
  0x1a   :  { %p1249_p11 = scmp.ne.s32.totalorder %s46_s24, %s1248_s12  ;;  %p1254_p13 = scmp.lt.s32.totalorder %s1248_s12, %s1248_s12 }
  0x1c   :  { %p1255_p0 = por %p1254_p13, %p1253_p12 }
  0x1e   :  { %p1256_p1 = pnand %p1255_p0, %p1249_p11 }
  0x20   :  { %1259 = shalt.err (!%p1256_p1)
}
  0x21   :  { %51 = dma.hbm_to_vmem [thread:$0]  %s1517_s7, 2048, %s46_s24, [#allocation5], %s1265_s19, %s1265_s19, %s1266_s20  }
  0x22   :  { %1260 = dma.done.wait [#allocation3], 12544  }
  0x23   :  { %1261 = vsyncadd [#allocation3], 4294954752 }
  0x24   :  { %1262 = dma.done.wait [#allocation5], 2048  }
  0x25   :  { %1263 = vsyncadd [#allocation5], 4294965248  ;;  %v83_v0 = vld [vmem:[#allocation2 + $0x80] sm:$0xff]  ;;  %v84_v1 = vld [vmem:[#allocation2 + $0x88] sm:$0xff]  ;;  %vm1269_vm0 = vmmov 0   ;;  %vm172_vm1 = vcmask 130048  }
  0x26   :  { %v67_v2 = vld [vmem:[#allocation2] sm:$0xff]  ;;  %v1030_v3 = vpack.c.bf16 %v84_v1, %v83_v0  ;;  %v68_v4 = vld [vmem:[#allocation2 + $0x8] sm:$0xff]  ;;  %v85_v11 = vld [vmem:[#allocation2 + $0x90] sm:$0xff] }
  0x27   :  { %v115_v5 = vld [vmem:[#allocation2 + $0x180] sm:$0xff]  ;;  %v116_v6 = vld [vmem:[#allocation2 + $0x188] sm:$0xff]  ;;  %v1032_v7 = vpack.c.bf16 %v68_v4, %v67_v2  ;;  %v86_v13 = vld [vmem:[#allocation2 + $0x98] sm:$0xff] }
  0x28   :  { %v1062_v8 = vpack.c.bf16 %v116_v6, %v115_v5  ;;  %v99_v9 = vld [vmem:[#allocation2 + $0x100] sm:$0xff]  ;;  %v100_v10 = vld [vmem:[#allocation2 + $0x108] sm:$0xff]  ;;  %1031 = vmatprep.subr.bf16.mxu0 %v1030_v3  ;;  %v69_v14 = vld [vmem:[#allocation2 + $0x10] sm:$0xff]  ;;  %v1034_v16 = vpack.c.bf16 %v86_v13, %v85_v11 }
  0x29   :  { %v1064_v12 = vpack.c.bf16 %v100_v10, %v99_v9  ;;  %v70_v15 = vld [vmem:[#allocation2 + $0x18] sm:$0xff]  ;;  %1033 = vmatpush3.bf16.msra.mxu0 %v1032_v7  ;;  %v117_v18 = vld [vmem:[#allocation2 + $0x190] sm:$0xff]  ;;  %v87_v23 = vld [vmem:[#allocation2 + $0xa0] sm:$0xff] }
  0x2a   :  { %1063 = vmatprep.subr.bf16.mxu1 %v1062_v8  ;;  %v1036_v17 = vpack.c.bf16 %v70_v15, %v69_v14  ;;  %v118_v19 = vld [vmem:[#allocation2 + $0x198] sm:$0xff]  ;;  %v101_v20 = vld [vmem:[#allocation2 + $0x110] sm:$0xff]  ;;  %v88_v24 = vld [vmem:[#allocation2 + $0xa8] sm:$0xff]  ;;  %1035 = vmatprep.subr.bf16.mxu0 %v1034_v16 }
  0x2b   :  { %1065 = vmatpush3.bf16.msra.mxu1 %v1064_v12  ;;  %v1066_v21 = vpack.c.bf16 %v118_v19, %v117_v18  ;;  %v102_v22 = vld [vmem:[#allocation2 + $0x118] sm:$0xff]  ;;  %v1038_v26 = vpack.c.bf16 %v88_v24, %v87_v23  ;;  %v71_v27 = vld [vmem:[#allocation2 + $0x20] sm:$0xff]  ;;  %v72_v28 = vld [vmem:[#allocation2 + $0x28] sm:$0xff] }
  0x2c   :  { %v1068_v25 = vpack.c.bf16 %v102_v22, %v101_v20  ;;  %v119_v29 = vld [vmem:[#allocation2 + $0x1a0] sm:$0xff]  ;;  %v120_v30 = vld [vmem:[#allocation2 + $0x1a8] sm:$0xff]  ;;  %v1040_v33 = vpack.c.bf16 %v72_v28, %v71_v27  ;;  %v89_v35 = vld [vmem:[#allocation2 + $0xb0] sm:$0xff] }
  0x2d   :  { %1067 = vmatprep.subr.bf16.mxu1 %v1066_v21  ;;  %v103_v31 = vld [vmem:[#allocation2 + $0x120] sm:$0xff]  ;;  %v104_v32 = vld [vmem:[#allocation2 + $0x128] sm:$0xff]  ;;  %1037 = vmatpush3.bf16.msra.mxu0 %v1036_v17  ;;  %v1070_v34 = vpack.c.bf16 %v120_v30, %v119_v29  ;;  %v90_v36 = vld [vmem:[#allocation2 + $0xb8] sm:$0xff] }
  0x2e   :  { %v73_v37 = vld [vmem:[#allocation2 + $0x30] sm:$0xff]  ;;  %1039 = vmatprep.subr.bf16.mxu0 %v1038_v26  ;;  %v1072_v38 = vpack.c.bf16 %v104_v32, %v103_v31  ;;  %v1042_v39 = vpack.c.bf16 %v90_v36, %v89_v35  ;;  %v74_v40 = vld [vmem:[#allocation2 + $0x38] sm:$0xff]  ;;  %v91_v46 = vld [vmem:[#allocation2 + $0xc0] sm:$0xff] }
  0x2f   :  { %1069 = vmatpush3.bf16.msra.mxu1 %v1068_v25  ;;  %v121_v41 = vld [vmem:[#allocation2 + $0x1b0] sm:$0xff]  ;;  %v122_v42 = vld [vmem:[#allocation2 + $0x1b8] sm:$0xff]  ;;  %v92_v47 = vld [vmem:[#allocation2 + $0xc8] sm:$0xff]  ;;  %v1044_v48 = vpack.c.bf16 %v74_v40, %v73_v37 }
  0x30   :  { %1071 = vmatprep.subr.bf16.mxu1 %v1070_v34  ;;  %v1074_v43 = vpack.c.bf16 %v122_v42, %v121_v41  ;;  %v105_v44 = vld [vmem:[#allocation2 + $0x130] sm:$0xff]  ;;  %v106_v45 = vld [vmem:[#allocation2 + $0x138] sm:$0xff]  ;;  %v123_v49 = vld [vmem:[#allocation2 + $0x1c0] sm:$0xff]  ;;  %v1046_v52 = vpack.c.bf16 %v92_v47, %v91_v46 }
  0x31   :  { %1041 = vmatpush3.bf16.msra.mxu0 %v1040_v33  ;;  %v124_v50 = vld [vmem:[#allocation2 + $0x1c8] sm:$0xff]  ;;  %v1076_v51 = vpack.c.bf16 %v106_v45, %v105_v44  ;;  %v75_v53 = vld [vmem:[#allocation2 + $0x40] sm:$0xff]  ;;  %v93_v58 = vld [vmem:[#allocation2 + $0xd0] sm:$0xff] }
  0x32   :  { %1043 = vmatprep.subr.bf16.mxu0 %v1042_v39  ;;  %v76_v54 = vld [vmem:[#allocation2 + $0x48] sm:$0xff]  ;;  %v107_v55 = vld [vmem:[#allocation2 + $0x140] sm:$0xff]  ;;  %v1078_v56 = vpack.c.bf16 %v124_v50, %v123_v49  ;;  %v94_v59 = vld [vmem:[#allocation2 + $0xd8] sm:$0xff]  ;;  %v1268_v50 = vmov 0.0|0.0  }
  0x33   :  { %1073 = vmatpush3.bf16.msra.mxu1 %v1072_v38  ;;  %v108_v57 = vld [vmem:[#allocation2 + $0x148] sm:$0xff]  ;;  %v125_v60 = vld [vmem:[#allocation2 + $0x1d0] sm:$0xff]  ;;  %v126_v61 = vld [vmem:[#allocation2 + $0x1d8] sm:$0xff]  ;;  %v1048_v62 = vpack.c.bf16 %v76_v54, %v75_v53  ;;  %v1050_v0 = vpack.c.bf16 %v94_v59, %v93_v58 }
  0x34   :  { %1075 = vmatprep.subr.bf16.mxu1 %v1074_v43  ;;  %v1080_v63 = vpack.c.bf16 %v108_v57, %v107_v55  ;;  %v77_v1 = vld [vmem:[#allocation2 + $0x50] sm:$0xff]  ;;  %v78_v2 = vld [vmem:[#allocation2 + $0x58] sm:$0xff]  ;;  %v1082_v4 = vpack.c.bf16 %v126_v61, %v125_v60  ;;  %v95_v6 = vld [vmem:[#allocation2 + $0xe0] sm:$0xff]  ;;  %v1270_v60 = vmov 0.0  }
  0x35   :  { %1045 = vmatpush3.bf16.msra.mxu0 %v1044_v48  ;;  %v109_v3 = vld [vmem:[#allocation2 + $0x150] sm:$0xff]  ;;  %v110_v5 = vld [vmem:[#allocation2 + $0x158] sm:$0xff]  ;;  %v96_v7 = vld [vmem:[#allocation2 + $0xe8] sm:$0xff]  ;;  %v1052_v10 = vpack.c.bf16 %v78_v2, %v77_v1 }
  0x36   :  { %1047 = vmatprep.subr.bf16.mxu0 %v1046_v52  ;;  %v127_v8 = vld [vmem:[#allocation2 + $0x1e0] sm:$0xff]  ;;  %v128_v9 = vld [vmem:[#allocation2 + $0x1e8] sm:$0xff]  ;;  %v1084_v13 = vpack.c.bf16 %v110_v5, %v109_v3  ;;  %v1054_v14 = vpack.c.bf16 %v96_v7, %v95_v6  ;;  %v97_v19 = vld [vmem:[#allocation2 + $0xf0] sm:$0xff] }
  0x37   :  { %1077 = vmatpush3.bf16.msra.mxu1 %v1076_v51  ;;  %v79_v11 = vld [vmem:[#allocation2 + $0x60] sm:$0xff]  ;;  %v61_v12 = vld [vmem:[%s1510_s0 + $0x8] sm:$0xff]  ;;  %v1086_v18 = vpack.c.bf16 %v128_v9, %v127_v8  ;;  %v98_v20 = vld [vmem:[#allocation2 + $0xf8] sm:$0xff] }
  0x38   :  { %1079 = vmatprep.subr.bf16.mxu1 %v1078_v56  ;;  %v80_v15 = vld [vmem:[#allocation2 + $0x68] sm:$0xff]  ;;  %v111_v16 = vld [vmem:[#allocation2 + $0x160] sm:$0xff]  ;;  %240 = vmatprep.mubr.f32.mxu0 %v61_v12  ;;  %v63_v21 = vld [vmem:[%s1510_s0 + $0x18] sm:$0xff]  ;;  %v1058_v26 = vpack.c.bf16 %v98_v20, %v97_v19 }
  0x39   :  { %1049 = vmatpush3.bf16.msra.mxu0 %v1048_v62  ;;  %v112_v17 = vld [vmem:[#allocation2 + $0x168] sm:$0xff]  ;;  %v129_v22 = vld [vmem:[#allocation2 + $0x1f0] sm:$0xff]  ;;  %v130_v23 = vld [vmem:[#allocation2 + $0x1f8] sm:$0xff]  ;;  %310 = vmatprep.mubr.f32.mxu1 %v63_v21  ;;  %v1056_v24 = vpack.c.bf16 %v80_v15, %v79_v11 }
  0x3a   :  { %1051 = vmatprep.subr.bf16.mxu0 %v1050_v0  ;;  %v1088_v25 = vpack.c.bf16 %v112_v17, %v111_v16  ;;  %v81_v27 = vld [vmem:[#allocation2 + $0x70] sm:$0xff]  ;;  %v82_v28 = vld [vmem:[#allocation2 + $0x78] sm:$0xff]  ;;  %v1090_v30 = vpack.c.bf16 %v130_v23, %v129_v22  ;;  %v147_v32 = vld [vmem:[#allocation2 + $0x280] sm:$0xff] }
  0x3b   :  { %1081 = vmatpush3.bf16.msra.mxu1 %v1080_v63  ;;  %v113_v29 = vld [vmem:[#allocation2 + $0x170] sm:$0xff]  ;;  %v114_v31 = vld [vmem:[#allocation2 + $0x178] sm:$0xff]  ;;  %v148_v33 = vld [vmem:[#allocation2 + $0x288] sm:$0xff]  ;;  %v1060_v34 = vpack.c.bf16 %v82_v28, %v81_v27 }
  0x3c   :  { %1083 = vmatprep.subr.bf16.mxu1 %v1082_v4  ;;  %v1092_v35 = vpack.c.bf16 %v114_v31, %v113_v29  ;;  %v1094_v36 = vpack.c.bf16 %v148_v33, %v147_v32  ;;  %v131_v37 = vld [vmem:[#allocation2 + $0x200] sm:$0xff]  ;;  %v132_v38 = vld [vmem:[#allocation2 + $0x208] sm:$0xff]  ;;  %v149_v39 = vld [vmem:[#allocation2 + $0x290] sm:$0xff] }
  0x3d   :  { %1053 = vmatpush3.bf16.msra.mxu0 %v1052_v10  ;;  %v150_v40 = vld [vmem:[#allocation2 + $0x298] sm:$0xff]  ;;  %v60_v41 = vld [vmem:[%s1510_s0] sm:$0xff]  ;;  %v1096_v42 = vpack.c.bf16 %v132_v38, %v131_v37  ;;  %v62_v43 = vld [vmem:[%s1510_s0 + $0x10] sm:$0xff] }
  0x3e   :  { %1055 = vmatprep.subr.bf16.mxu0 %v1054_v14  ;;  %v133_v44 = vld [vmem:[#allocation2 + $0x210] sm:$0xff]  ;;  %v1098_v45 = vpack.c.bf16 %v150_v40, %v149_v39  ;;  %v134_v46 = vld [vmem:[#allocation2 + $0x218] sm:$0xff]  ;;  %v151_v47 = vld [vmem:[#allocation2 + $0x2a0] sm:$0xff] }
  0x3f   :  { %1085 = vmatpush3.bf16.msra.mxu1 %v1084_v13  ;;  %v152_v48 = vld [vmem:[#allocation2 + $0x2a8] sm:$0xff]  ;;  %v163_v51 = vld [vmem:[#allocation2 + $0x300] sm:$0xff]  ;;  %v1100_v54 = vpack.c.bf16 %v134_v46, %v133_v44  ;;  %v153_v58 = vld [vmem:[#allocation2 + $0x2b0] sm:$0xff] }
  0x40   :  { %1087 = vmatprep.subr.bf16.mxu1 %v1086_v18  ;;  %v65_v49 = vld [vmem:[%s1510_s0 + $0x28] sm:$0xff]  ;;  %v1102_v55 = vpack.c.bf16 %v152_v48, %v151_v47  ;;  %v135_v56 = vld [vmem:[#allocation2 + $0x220] sm:$0xff]  ;;  %v154_v59 = vld [vmem:[#allocation2 + $0x2b8] sm:$0xff] }
  0x41   :  { %1057 = vmatpush3.bf16.msra.mxu0 %v1056_v24  ;;  %v164_v52 = vld [vmem:[#allocation2 + $0x308] sm:$0xff]  ;;  %v66_v61 = vld [vmem:[%s1510_s0 + $0x30] sm:$0xff]  ;;  %v1106_v63 = vpack.c.bf16 %v154_v59, %v153_v58  ;;  %v138_v1 = vld [vmem:[#allocation2 + $0x238] sm:$0xff] }
  0x42   :  { %1059 = vmatprep.subr.bf16.mxu0 %v1058_v26  ;;  %v1127_v53 = vpack.c.bf16 %v164_v52, %v163_v51  ;;  %v136_v57 = vld [vmem:[#allocation2 + $0x228] sm:$0xff]  ;;  %v137_v0 = vld [vmem:[#allocation2 + $0x230] sm:$0xff]  ;;  %v155_v2 = vld [vmem:[#allocation2 + $0x2c0] sm:$0xff] }
  0x43   :  { %1089 = vmatpush3.bf16.msra.mxu1 %v1088_v25  ;;  %v1104_v62 = vpack.c.bf16 %v136_v57, %v135_v56  ;;  %v156_v3 = vld [vmem:[#allocation2 + $0x2c8] sm:$0xff]  ;;  %v1108_v4 = vpack.c.bf16 %v138_v1, %v137_v0  ;;  %v139_v6 = vld [vmem:[#allocation2 + $0x240] sm:$0xff]  ;;  %v157_v8 = vld [vmem:[#allocation2 + $0x2d0] sm:$0xff] }
  0x44   :  { %1091 = vmatprep.subr.bf16.mxu1 %v1090_v30  ;;  %v1110_v5 = vpack.c.bf16 %v156_v3, %v155_v2  ;;  %v140_v7 = vld [vmem:[#allocation2 + $0x248] sm:$0xff]  ;;  %v158_v9 = vld [vmem:[#allocation2 + $0x2d8] sm:$0xff]  ;;  %v141_v12 = vld [vmem:[#allocation2 + $0x250] sm:$0xff] }
  0x45   :  { %1061 = vmatpush3.bf16.msra.mxu0 %v1060_v34  ;;  %v1112_v10 = vpack.c.bf16 %v140_v7, %v139_v6  ;;  %v1114_v11 = vpack.c.bf16 %v158_v9, %v157_v8  ;;  %v142_v13 = vld [vmem:[#allocation2 + $0x258] sm:$0xff]  ;;  %v159_v14 = vld [vmem:[#allocation2 + $0x2e0] sm:$0xff]  ;;  %v160_v15 = vld [vmem:[#allocation2 + $0x2e8] sm:$0xff] }
  0x46   :  { %1095 = vmatprep.subr.bf16.mxu0 %v1094_v36  ;;  %v1116_v16 = vpack.c.bf16 %v142_v13, %v141_v12  ;;  %v1118_v17 = vpack.c.bf16 %v160_v15, %v159_v14  ;;  %v143_v18 = vld [vmem:[#allocation2 + $0x260] sm:$0xff]  ;;  %v144_v19 = vld [vmem:[#allocation2 + $0x268] sm:$0xff]  ;;  %v161_v20 = vld [vmem:[#allocation2 + $0x2f0] sm:$0xff] }
  0x47   :  { %1093 = vmatpush3.bf16.msra.mxu1 %v1092_v35  ;;  %v162_v21 = vld [vmem:[#allocation2 + $0x2f8] sm:$0xff]  ;;  %v1120_v22 = vpack.c.bf16 %v144_v19, %v143_v18  ;;  %v145_v24 = vld [vmem:[#allocation2 + $0x270] sm:$0xff]  ;;  %v64_v27 = vld [vmem:[%s1510_s0 + $0x20] sm:$0xff] }
  0x48   :  { %1126 = vmatprep.subr.bf16.mxu1 %v1268_v50  ;;  %241 = vmatmul.mubr.f32.vlgmr.msra.gmra.mrb[0].mxu0 %v60_v41  ;;  %v1122_v23 = vpack.c.bf16 %v162_v21, %v161_v20  ;;  %v146_v25 = vld [vmem:[#allocation2 + $0x278] sm:$0xff]  ;;  %v456_v28 = vld [vmem:[%s1513_s3] sm:$0xff]  ;;  %v457_v29 = vld [vmem:[%s1513_s3 + $0x8] sm:$0xff] }
  0x49   :  { %1097 = vmatpush3.bf16.msra.mxu0 %v1096_v42  ;;  %380 = vmatprep.mubr.f32.mxu0 %v65_v49  ;;  %v1124_v26 = vpack.c.bf16 %v146_v25, %v145_v24  ;;  %v458_v30 = vld [vmem:[%s1513_s3 + $0x10] sm:$0xff]  ;;  %v1130_v31 = vpack.c.bf16 %v457_v29, %v456_v28  ;;  %v459_v32 = vld [vmem:[%s1513_s3 + $0x18] sm:$0xff]  ;;  %v460_v34 = vld [vmem:[%s1513_s3 + $0x20] sm:$0xff] }
  0x4a   :  { %311 = vmatmul.mubr.f32.vlgmr.msra.gmra.mrb[0].mxu1 %v62_v43  ;;  %1099 = vmatprep.subr.bf16.mxu0 %v1098_v45  ;;  %v1133_v33 = vpack.c.bf16 %v459_v32, %v458_v30  ;;  %v461_v35 = vld [vmem:[%s1513_s3 + $0x28] sm:$0xff]  ;;  %v462_v37 = vld [vmem:[%s1513_s3 + $0x30] sm:$0xff]  ;;  %v463_v38 = vld [vmem:[%s1513_s3 + $0x38] sm:$0xff] }
  0x4b   :  { %1128 = vmatpush3.bf16.msra.mxu1 %v1127_v53  ;;  %922 = vmatprep.mubr.msk.f32.mxu1 %vm1269_vm0, %v1270_v60  ;;  %v1136_v36 = vpack.c.bf16 %v461_v35, %v460_v34  ;;  %v1139_v39 = vpack.c.bf16 %v463_v38, %v462_v37  ;;  %v464_v40 = vld [vmem:[%s1513_s3 + $0x40] sm:$0xff]  ;;  %v465_v41 = vld [vmem:[%s1513_s3 + $0x48] sm:$0xff]  ;;  %v466_v43 = vld [vmem:[%s1513_s3 + $0x50] sm:$0xff] }
  0x4c   :  { %1129 = vmatprep.subr.bf16.mxu1 %v1268_v50  ;;  %v1142_v42 = vpack.c.bf16 %v465_v41, %v464_v40  ;;  %v467_v44 = vld [vmem:[%s1513_s3 + $0x58] sm:$0xff]  ;;  %v468_v46 = vld [vmem:[%s1513_s3 + $0x60] sm:$0xff]  ;;  %v469_v47 = vld [vmem:[%s1513_s3 + $0x68] sm:$0xff] }
  0x4d   :  { %1101 = vmatpush3.bf16.msra.mxu0 %v1100_v54  ;;  %v1145_v45 = vpack.c.bf16 %v467_v44, %v466_v43  ;;  %v1148_v48 = vpack.c.bf16 %v469_v47, %v468_v46  ;;  %v470_v49 = vld [vmem:[%s1513_s3 + $0x70] sm:$0xff]  ;;  %v471_v51 = vld [vmem:[%s1513_s3 + $0x78] sm:$0xff]  ;;  %v550_v53 = vld [vmem:[%s1515_s5] sm:$0xff] }
  0x4e   :  { %1103 = vmatprep.subr.bf16.mxu0 %v1102_v55  ;;  %923 = vmatmul.mubr.msk.f32.vlgmr.msra.gmra.mrb[2].mxu1 %vm172_vm1, %v66_v61  ;;  %v1151_v52 = vpack.c.bf16 %v471_v51, %v470_v49  ;;  %v551_v54 = vld [vmem:[%s1515_s5 + $0x8] sm:$0xff]  ;;  %v552_v55 = vld [vmem:[%s1515_s5 + $0x10] sm:$0xff]  ;;  %v553_v57 = vld [vmem:[%s1515_s5 + $0x18] sm:$0xff] }
  0x4f   :  { %957 = vmatprep.mubr.msk.f32.mxu1 %vm1269_vm0, %v1270_v60  ;;  %1131 = vmatpush3.bf16.msra.mxu1 %v1130_v31  ;;  %v1154_v56 = vpack.c.bf16 %v551_v54, %v550_v53  ;;  %v1157_v58 = vpack.c.bf16 %v553_v57, %v552_v55  ;;  %v554_v59 = vld [vmem:[%s1515_s5 + $0x20] sm:$0xff]  ;;  %v555_v61 = vld [vmem:[%s1515_s5 + $0x28] sm:$0xff]  ;;  %v557_v0 = vld [vmem:[%s1515_s5 + $0x38] sm:$0xff] }
  0x50   :  { %1132 = vmatprep.subr.bf16.mxu1 %v1268_v50  ;;  %v558_v2 = vld [vmem:[%s1515_s5 + $0x40] sm:$0xff]  ;;  %v559_v3 = vld [vmem:[%s1515_s5 + $0x48] sm:$0xff]  ;;  %v560_v21 = vld [vmem:[%s1515_s5 + $0x50] sm:$0xff] }
  0x51   :  { %1105 = vmatpush3.bf16.msra.mxu0 %v1104_v62  ;;  %v1160_v62 = vpack.c.bf16 %v555_v61, %v554_v59  ;;  %v754_v6 = vld [vmem:[%s1512_s2] ss:$0 sm:$0xff]  ;;  %v563_v25 = vld [vmem:[%s1515_s5 + $0x68] sm:$0xff]  ;;  %v644_v29 = vld [vmem:[#allocation4] sm:$0xff] }
  0x52   :  { %1107 = vmatprep.subr.bf16.mxu0 %v1106_v63  ;;  %v556_v63 = vld [vmem:[%s1515_s5 + $0x30] sm:$0xff]  ;;  %v562_v24 = vld [vmem:[%s1515_s5 + $0x60] sm:$0xff]  ;;  %v645_v30 = vld [vmem:[#allocation4 + $0x8] sm:$0xff] }
  0x53   :  { %1134 = vmatpush3.bf16.msra.mxu1 %v1133_v33  ;;  %v1163_v1 = vpack.c.bf16 %v557_v0, %v556_v63  ;;  %v646_v31 = vld [vmem:[#allocation4 + $0x10] sm:$0xff]  ;;  %v1178_v32 = vpack.c.bf16 %v645_v30, %v644_v29  ;;  %v647_v33 = vld [vmem:[#allocation4 + $0x18] sm:$0xff]  ;;  %v648_v35 = vld [vmem:[#allocation4 + $0x20] sm:$0xff] }
  0x54   :  { %1135 = vmatprep.subr.bf16.mxu1 %v1268_v50  ;;  %v1181_v34 = vpack.c.bf16 %v647_v33, %v646_v31  ;;  %v650_v38 = vld [vmem:[#allocation4 + $0x30] sm:$0xff]  ;;  %v652_v41 = vld [vmem:[#allocation4 + $0x40] sm:$0xff]  ;;  %v655_v51 = vld [vmem:[#allocation4 + $0x58] sm:$0xff] }
  0x55   :  { %1109 = vmatpush3.bf16.msra.mxu0 %v1108_v4  ;;  %v1166_v4 = vpack.c.bf16 %v559_v3, %v558_v2  ;;  %v756_v44 = vld [vmem:[%s1514_s4] ss:$0 sm:$0xff]  ;;  %v656_v53 = vld [vmem:[#allocation4 + $0x60] sm:$0xff]  ;;  %v657_v54 = vld [vmem:[#allocation4 + $0x68] sm:$0xff] }
  0x56   :  { %1111 = vmatprep.subr.bf16.mxu0 %v1110_v5  ;;  %v654_v49 = vld [vmem:[#allocation4 + $0x50] sm:$0xff]  ;;  %v1196_v55 = vpack.c.bf16 %v657_v54, %v656_v53  ;;  %v659_v57 = vld [vmem:[#allocation4 + $0x78] sm:$0xff] }
  0x57   :  { %1137 = vmatpush3.bf16.msra.mxu1 %v1136_v36  ;;  %v649_v36 = vld [vmem:[#allocation4 + $0x28] sm:$0xff]  ;;  %v757_v59 = vld [vmem:[%s1516_s6] ss:$0 sm:$0xff] }
  0x58   :  { %1138 = vmatprep.subr.bf16.mxu1 %v1268_v50  ;;  %v1184_v37 = vpack.c.bf16 %v649_v36, %v648_v35 }
  0x59   :  { %1113 = vmatpush3.bf16.msra.mxu0 %v1112_v10 }
  0x5a   :  { %1115 = vmatprep.subr.bf16.mxu0 %v1114_v11 }
  0x5b   :  { %1140 = vmatpush3.bf16.msra.mxu1 %v1139_v39  ;;  %v651_v39 = vld [vmem:[#allocation4 + $0x38] sm:$0xff] }
  0x5c   :  { %1141 = vmatprep.subr.bf16.mxu1 %v1268_v50  ;;  %v1187_v40 = vpack.c.bf16 %v651_v39, %v650_v38 }
  0x5d   :  { %1117 = vmatpush3.bf16.msra.mxu0 %v1116_v16 }
  0x5e   :  { %1119 = vmatprep.subr.bf16.mxu0 %v1118_v17 }
  0x5f   :  { %1143 = vmatpush3.bf16.msra.mxu1 %v1142_v42  ;;  %v653_v42 = vld [vmem:[#allocation4 + $0x48] sm:$0xff] }
  0x60   :  { %1144 = vmatprep.subr.bf16.mxu1 %v1268_v50  ;;  %v1190_v43 = vpack.c.bf16 %v653_v42, %v652_v41 }
  0x61   :  { %1121 = vmatpush3.bf16.msra.mxu0 %v1120_v22  ;;  %v561_v22 = vld [vmem:[%s1515_s5 + $0x58] sm:$0xff] }
  0x62   :  { %1123 = vmatprep.subr.bf16.mxu0 %v1122_v23  ;;  %v1169_v23 = vpack.c.bf16 %v561_v22, %v560_v21 }
  0x63   :  { %1146 = vmatpush3.bf16.msra.mxu1 %v1145_v45 }
  0x64   :  { %1147 = vmatprep.subr.bf16.mxu1 %v1268_v50 }
  0x65   :  { %1125 = vmatpush3.bf16.msra.mxu0 %v1124_v26  ;;  %v564_v26 = vld [vmem:[%s1515_s5 + $0x70] sm:$0xff] }
  0x66   :  { %1153 = vmatprep.subr.bf16.mxu0 %v1268_v50 }
  0x67   :  { %1149 = vmatpush3.bf16.msra.mxu1 %v1148_v48 }
  0x68   :  { %381 = vmatmul.mubr.f32.vlgmr.msra.gmra.mrb[2].mxu0 %v64_v27  ;;  %1150 = vmatprep.subr.bf16.mxu1 %v1268_v50  ;;  %v565_v27 = vld [vmem:[%s1515_s5 + $0x78] sm:$0xff] }
  0x69   :  { %992 = vmatprep.mubr.msk.f32.mxu0 %vm1269_vm0, %v1270_v60  ;;  %1155 = vmatpush3.bf16.msra.mxu0 %v1154_v56  ;;  %v1175_v28 = vpack.c.bf16 %v565_v27, %v564_v26  ;;  %v658_v56 = vld [vmem:[#allocation4 + $0x70] sm:$0xff] }
  0x6a   :  { %1156 = vmatprep.subr.bf16.mxu0 %v1268_v50 }
  0x6b   :  { %1152 = vmatpush3.bf16.msra.mxu1 %v1151_v52  ;;  %v1193_v52 = vpack.c.bf16 %v655_v51, %v654_v49 }
  0x6c   :  { %1177 = vmatprep.subr.bf16.mxu1 %v1268_v50 }
  0x6d   :  { %1158 = vmatpush3.bf16.msra.mxu0 %v1157_v58  ;;  %v1199_v58 = vpack.c.bf16 %v659_v57, %v658_v56 }
  0x6e   :  { %1159 = vmatprep.subr.bf16.mxu0 %v1268_v50 }
  0x71   :  { %1161 = vmatpush3.bf16.msra.mxu0 %v1160_v62 }
  0x72   :  { %1162 = vmatprep.subr.bf16.mxu0 %v1268_v50 }
  0x75   :  { %1164 = vmatpush3.bf16.msra.mxu0 %v1163_v1  ;;  %v758_v1 = vld [vmem:[%s1518_s8] ss:$0 sm:$0xff] }
  0x76   :  { %1165 = vmatprep.subr.bf16.mxu0 %v1268_v50 }
  0x79   :  { %1167 = vmatpush3.bf16.msra.mxu0 %v1166_v4 }
  0x7a   :  { %1168 = vmatprep.subr.bf16.mxu0 %v1268_v50 }
  0x7d   :  { %1170 = vmatpush3.bf16.msra.mxu0 %v1169_v23 }
  0x7e   :  { %1171 = vmatprep.subr.bf16.mxu0 %v1268_v50 }
 0x11b   :  { %v791_v5 = vpop.f32.mrb[0].mxu0 }
 0x11c   :  { %v792_v7 = vpop.f32.mrb[1].mxu0 }
 0x11d   :  { %v826_v8 = vpop.f32.mrb[0].mxu1  ;;  %v793_v9 = vadd.f32 %v792_v7, %v791_v5 }
 0x11e   :  { %v827_v10 = vpop.f32.mrb[1].mxu1 }
 0x11f   :  { %v828_v11 = vadd.f32 %v827_v10, %v826_v8  ;;  %v243_v12 = vadd.f32 %v793_v9, %v754_v6 }
 0x121   :  { %v313_v13 = vadd.f32 %v828_v11, %v243_v12  ;;  %v452_v14 = vpop.f32.mrb[2].mxu1 }
 0x122   :  { %v924_v15 = vpop.f32.mrb[3].mxu1 }
 0x13b   :  { %v861_v16 = vpop.f32.mrb[2].mxu0 }
 0x13c   :  { %v862_v17 = vpop.f32.mrb[3].mxu0 }
 0x13d   :  { %v863_v18 = vadd.f32 %v862_v17, %v861_v16 }
 0x13f   :  { %v383_v19 = vadd.f32 %v863_v18, %v313_v13 }
 0x141   :  { %v453_v20 = vadd.f32 %v452_v14, %v383_v19 }
 0x143   :  { %958 = vmatmul.mubr.f32.vlgmr.msra.gmra.mrb[4].mxu1 %v453_v20 }
 0x144   :  { %1027 = vmatprep.mubr.msk.f32.mxu1 %vm1269_vm0, %v1270_v60  ;;  %v1172_v60 = vpack.c.bf16 %v563_v25, %v562_v24  ;;  %1179 = vmatpush3.bf16.msra.mxu1 %v1178_v32 }
 0x145   :  { %1180 = vmatprep.subr.bf16.mxu1 %v1268_v50 }
 0x146   :  { %1173 = vmatpush3.bf16.msra.mxu0 %v1172_v60 }
 0x147   :  { %1174 = vmatprep.subr.bf16.mxu0 %v1268_v50 }
 0x148   :  { %1182 = vmatpush3.bf16.msra.mxu1 %v1181_v34 }
 0x149   :  { %1183 = vmatprep.subr.bf16.mxu1 %v1268_v50 }
 0x14a   :  { %1176 = vmatpush3.bf16.msra.mxu0 %v1175_v28 }
 0x14c   :  { %1185 = vmatpush3.bf16.msra.mxu1 %v1184_v37 }
 0x14d   :  { %1186 = vmatprep.subr.bf16.mxu1 %v1268_v50 }
 0x150   :  { %1188 = vmatpush3.bf16.msra.mxu1 %v1187_v40 }
 0x151   :  { %1189 = vmatprep.subr.bf16.mxu1 %v1268_v50 }
 0x154   :  { %1191 = vmatpush3.bf16.msra.mxu1 %v1190_v43 }
 0x155   :  { %1192 = vmatprep.subr.bf16.mxu1 %v1268_v50 }
 0x158   :  { %1194 = vmatpush3.bf16.msra.mxu1 %v1193_v52 }
 0x159   :  { %1195 = vmatprep.subr.bf16.mxu1 %v1268_v50 }
 0x15c   :  { %1197 = vmatpush3.bf16.msra.mxu1 %v1196_v55 }
 0x15d   :  { %1198 = vmatprep.subr.bf16.mxu1 %v1268_v50 }
 0x160   :  { %1200 = vmatpush3.bf16.msra.mxu1 %v1199_v58 }
 0x216   :  { %v545_v45 = vpop.f32.mrb[4].mxu1 }
 0x217   :  { %v546_v46 = vadd.f32 %v756_v44, %v545_v45  ;;  %v959_v47 = vpop.f32.mrb[5].mxu1 }
 0x219   :  { %1208 = vtanh.f32 %v546_v46 }
 0x223   :  { %v1209_v48 = vpop.eup %1208 }
 0x224   :  { %993 = vmatmul.mubr.f32.vlgmr.msra.gmra.mrb[4].mxu0 %v1209_v48 }
 0x2f7   :  { %v639_v61 = vpop.f32.mrb[4].mxu0 }
 0x2f8   :  { %v640_v62 = vadd.f32 %v757_v59, %v639_v61  ;;  %v994_v63 = vpop.f32.mrb[5].mxu0 }
 0x2fa   :  { %1210 = vtanh.f32 %v640_v62 }
 0x304   :  { %v1211_v0 = vpop.eup %1210 }
 0x305   :  { %1028 = vmatmul.mubr.f32.vlgmr.msra.gmra.mrb[6].mxu1 %v1211_v0 }
 0x3d8   :  { %v733_v2 = vpop.f32.mrb[6].mxu1 }
 0x3d9   :  { %v734_v3 = vadd.f32 %v758_v1, %v733_v2  ;;  %v1029_v4 = vpop.f32.mrb[7].mxu1 }
 0x3db   :  { %737 = vmax.xlane.f32.xlu0 %v734_v3 }
 0x468   :  { %v738_v50 = vpop.xlane.xlu0 %737 }
 0x469   :  { %v739_v5 = vsub.f32 %v734_v3, %v738_v50 }
 0x46b   :  { %v740_v6 = vmul.f32 1.442695, %v739_v5 }
 0x46d   :  { %1212 = vpow2.f32 %v740_v6 }
 0x477   :  { %v1213_v7 = vpop.eup %1212 }
 0x478   :  { %742 = vadd.xlane.f32.xlu0 %v1213_v7 }
 0x505   :  { %v743_v8 = vpop.xlane.xlu0 %742 }
 0x506   :  { %1214 = vlog2.f32 %v743_v8 }
 0x510   :  { %v1215_v9 = vpop.eup %1214 }
 0x511   :  { %v745_v10 = vmul.f32 0.6931472, %v1215_v9 }
 0x513   :  { %v746_v11 = vsub.f32 %v739_v5, %v745_v10 }
 0x515   :  { %747 = vst [vmem:[%s1519_s9] sm:$0xff] %v746_v11 }
 0x516   :  { %752 = vsyncpa [#allocation3], 1 }
 0x517   :  { %753 = vsyncpa [#allocation5], 1 }

</bundles_post_ra>
